<compile_context>
chip_gen: v6e
topology: v6e:2x2x1
jax: 0.10.0
libtpu: 0.0.40
codegen_flags: <defaults>
</compile_context>

<pallas_src>
import functools

import jax
import jax.numpy as jnp
from jax import lax
from jax.experimental import pallas as pl
from jax.experimental.pallas import tpu as pltpu


_OUT_LANES = 128  # lane-dense per-row output width


def _round_up(x, m):
    return (x + m - 1) // m * m


def _device_config():
    """Best-effort device-aware (tn_target, vmem_budget_bytes)."""
    kind = ""
    try:
        kind = jax.devices()[0].device_kind.lower()
    except Exception:  # pragma: no cover - device query is best-effort
        pass
    if "v5" in kind:
        # v5e: 128-aligned tiles, 128 MiB physical VMEM, weakest HBM.
        return 512, 96 * 1024 * 1024
    if "v6" in kind:
        # v6e: 128 MiB physical VMEM -> generous residency budget.
        return 1024, 96 * 1024 * 1024
    # v7x (64 MiB physical VMEM per TC) or unknown: stay conservative.
    return 1024, 48 * 1024 * 1024


def _normalize_kernel(x_ref, o_ref, *, inv_sqrt_temp):
    """Row-wise L2 normalization with 1/sqrt(temperature) folded in; casts to
    the compute dtype (bf16 by default) for the MXU."""
    x = x_ref[...]                                             # (tm, Dp) f32
    sumsq = jnp.sum(x * x, axis=1, keepdims=True)              # (tm, 1)
    # torch F.normalize(x, dim=1) == x / max(||x||, 1e-12); rsqrt goes to EUP.
    scale = lax.rsqrt(jnp.maximum(sumsq, 1e-24)) * inv_sqrt_temp
    o_ref[...] = (x * scale).astype(o_ref.dtype)


def _infonce_tiled_kernel(a_ref, b_ref, lrow_ref, lcol_ref, out_ref,
                          acc_exp, acc_num, acc_den, *,
                          tn, m_actual, l_actual, m_pad, resident_b):
    """One (i, j) tile of the InfoNCE loss with per-row running accumulators.

    a_ref:    (tm, Dp) row tile of normalized/scaled projections (compute dtype)
    b_ref:    (M_pad, Dp) resident column operand OR (tn, Dp) column tile
    lrow_ref: (tm, 1) int32 row labels;  lcol_ref: (1, tn) int32 column labels
    out_ref:  (tm, 128) lane-dense per-row loss contributions (written at last j)
    """
    i = pl.program_id(0)
    j = pl.program_id(1)
    tm = a_ref.shape[0]

    @pl.when(j == 0)
    def _():
        acc_exp[...] = jnp.zeros_like(acc_exp)
        acc_num[...] = jnp.zeros_like(acc_num)
        acc_den[...] = jnp.zeros_like(acc_den)

    a = a_ref[...]                                             # (tm, Dp)
    if resident_b:
        if tn == m_pad:
            b = b_ref[...]                                     # whole array
        else:
            col0 = pl.multiple_of(j * tn, tn)
            b = b_ref[pl.ds(col0, tn), :]                      # (tn, Dp)
    else:
        b = b_ref[...]                                         # (tn, Dp)

    # sim_ij = <x_i, x_j> / temperature (temperature already folded in).
    # Contract the last dims directly (flash-attn 'qd,kd->qk' form, no
    # explicit transpose of the column tile).
    sim = lax.dot_general(a, b,
                          dimension_numbers=(((1,), (1,)), ((), ())),
                          preferred_element_type=jnp.float32)  # (tm, tn) f32

    row_lab = lrow_ref[...]                                    # (tm, 1)
    col_lab = lcol_ref[...]                                    # (1, tn)

    # Positive mask WITHOUT the diagonal exclusion; the self-pair is removed
    # algebraically at finalization (sim_ii is recomputed exactly from the row
    # tile, which also covers zero-norm rows where sim_ii != 1/T).
    same = row_lab == col_lab                                  # (tm, tn) bool
    need_cols = (m_actual < m_pad) or (l_actual < m_pad)
    if need_cols:
        col_ids = lax.broadcasted_iota(jnp.int32, (1, tn), 1) + j * tn
    if l_actual < m_pad:
        row_ids = lax.broadcasted_iota(jnp.int32, (tm, 1), 0) + i * tm
        same = same & (row_ids < l_actual) & (col_ids < l_actual)
    mask = same.astype(jnp.float32)

    e = jnp.exp(sim)
    if m_actual < m_pad:
        # Padded columns must not contribute to the softmax denominator.
        e = jnp.where(col_ids < m_actual, e, 0.0)

    acc_exp[...] += jnp.sum(e, axis=1, keepdims=True)
    acc_num[...] += jnp.sum(mask * sim, axis=1, keepdims=True)
    acc_den[...] += jnp.sum(mask, axis=1, keepdims=True)

    @pl.when(j == pl.num_programs(1) - 1)
    def _():
        rid = lax.broadcasted_iota(jnp.int32, (tm, 1), 0) + i * tm
        # Remove the self-pair counted by the maskless accumulation for every
        # labeled row: subtract sim_ii (== ||x_i||^2 / T, matching what the
        # MXU computed) from the numerator and 1 from the pair count.
        af = a.astype(jnp.float32)
        diag = jnp.sum(af * af, axis=1, keepdims=True)         # (tm, 1)
        has_diag = rid < l_actual
        num = acc_num[...] - jnp.where(has_diag, diag, 0.0)
        den = acc_den[...] - jnp.where(has_diag, 1.0, 0.0)
        # -mean_log_prob_i = log(sum_j exp(sim_ij)) - (sum_j mask*sim)/(sum mask)
        contrib = jnp.log(acc_exp[...]) - num / den            # (tm, 1)
        contrib = jnp.where(rid < m_actual, contrib, 0.0)      # zero padded rows
        out_ref[...] = jnp.broadcast_to(contrib, (tm, _OUT_LANES))


def contrastive_loss(projections, labels, temperature=0.5,
                     compute_dtype=jnp.bfloat16):
    """Pallas-backed ContrastiveLoss.forward(projections, labels)."""
    projections = jnp.asarray(projections, dtype=jnp.float32)
    labels = jnp.asarray(labels, dtype=jnp.int32)
    M, D = projections.shape
    L = labels.shape[0]

    tn_target, vmem_budget = _device_config()
    if M <= 256:
        tm = tn = M_pad = _round_up(max(M, 8), 8)              # single tile
    else:
        tm = 256                                   # keeps >= 2 i-steps so both
        tn = min(tn_target, _round_up(M, 256))     # v7x TensorCores get work
        M_pad = _round_up(M, tn)
    D_pad = _round_up(D, 128)

    compute_bytes = jnp.dtype(compute_dtype).itemsize

    # Keep the column operand fully VMEM-resident (DMA'd once) when it fits
    # comfortably, counting potential double-buffering plus (tm, tn) f32
    # temporaries; otherwise fall back to streaming (tn, D_pad) column tiles.
    resident_bytes = 2 * M_pad * D_pad * compute_bytes
    tile_bytes = 4 * tm * D_pad * compute_bytes + 8 * tm * tn * 4
    resident_b = resident_bytes + tile_bytes < (2 * vmem_budget) // 3

    # Zero-pad features/rows; padded rows/cols are excluded in-kernel.
    x = jnp.zeros((M_pad, D_pad), jnp.float32).at[:M, :D].set(projections)
    lab = jnp.full((M_pad,), -1, jnp.int32).at[:L].set(labels)
    lab_row = lab.reshape(M_pad, 1)
    lab_col = lab.reshape(1, M_pad)

    inv_sqrt_temp = 1.0 / (float(temperature) ** 0.5)

    # ---- Prologue: normalize each row once, fold 1/sqrt(T), cast to bf16. ----
    xn = pl.pallas_call(
        functools.partial(_normalize_kernel, inv_sqrt_temp=inv_sqrt_temp),
        out_shape=jax.ShapeDtypeStruct((M_pad, D_pad), compute_dtype),
        grid=(M_pad // tm,),
        in_specs=[pl.BlockSpec((tm, D_pad), lambda i: (i, 0))],
        out_specs=pl.BlockSpec((tm, D_pad), lambda i: (i, 0)),
        compiler_params=pltpu.CompilerParams(
            dimension_semantics=("parallel",)),
    )(x)

    # ---- Main flash-style tiled InfoNCE kernel. ----
    grid = (M_pad // tm, M_pad // tn)
    kernel = functools.partial(
        _infonce_tiled_kernel, tn=tn, m_actual=M, l_actual=L, m_pad=M_pad,
        resident_b=resident_b)

    if resident_b:
        b_spec = pl.BlockSpec((M_pad, D_pad), lambda i, j: (0, 0))  # DMA once
        b_reads = 1
    else:
        b_spec = pl.BlockSpec((tn, D_pad), lambda i, j: (j, 0))
        b_reads = grid[0]

    cost = pl.CostEstimate(
        flops=2 * M_pad * M_pad * D_pad,
        transcendentals=M_pad * M_pad + M_pad,
        bytes_accessed=(compute_bytes * M_pad * D_pad * (1 + b_reads)
                        + 4 * (2 * M_pad + M_pad * _OUT_LANES)),
    )

    per_row = pl.pallas_call(
        kernel,
        out_shape=jax.ShapeDtypeStruct((M_pad, _OUT_LANES), jnp.float32),
        grid_spec=pltpu.PrefetchScalarGridSpec(
            num_scalar_prefetch=0,
            grid=grid,
            in_specs=[
                pl.BlockSpec((tm, D_pad), lambda i, j: (i, 0)),   # row tile
                b_spec,                                           # col operand
                pl.BlockSpec((tm, 1), lambda i, j: (i, 0)),       # row labels
                pl.BlockSpec((1, tn), lambda i, j: (0, j)),       # col labels
            ],
            out_specs=pl.BlockSpec((tm, _OUT_LANES), lambda i, j: (i, 0)),
            scratch_shapes=[pltpu.VMEM((tm, 1), jnp.float32),     # sum exp
                            pltpu.VMEM((tm, 1), jnp.float32),     # sum mask*sim
                            pltpu.VMEM((tm, 1), jnp.float32)],    # sum mask
        ),
        compiler_params=pltpu.CompilerParams(
            dimension_semantics=("parallel", "arbitrary"),
            vmem_limit_bytes=vmem_budget,
        ),
        cost_estimate=cost,
    )(xn, xn, lab_row, lab_col)

    # Tiny epilogue: padded rows were zeroed in-kernel, so sum / M is the mean
    # of -mean_log_prob over the real rows.
    return jnp.sum(per_row[:, 0]) / M


def _reference_loss(projections, labels, temperature=0.5):
    """Pure-JAX reference mirroring the PyTorch module (for verification)."""
    x = projections.astype(jnp.float32)
    norm = jnp.sqrt(jnp.sum(x * x, axis=1, keepdims=True))
    xn = x / jnp.maximum(norm, 1e-12)
    sim = jnp.matmul(xn, xn.T, precision=lax.Precision.HIGHEST) / temperature
    M = x.shape[0]
    L = labels.shape[0]
    eq = (labels[:, None] == labels[None, :]) & (~jnp.eye(L, dtype=bool))
    mask = jnp.zeros((M, M), jnp.float32).at[:L, :L].set(eq.astype(jnp.float32))
    log_prob = sim - jnp.log(jnp.sum(jnp.exp(sim), axis=1, keepdims=True))
    mean_log_prob = jnp.sum(mask * log_prob, axis=1) / jnp.sum(mask, axis=1)
    return -jnp.mean(mean_log_prob)


if __name__ == "__main__":
    key = jax.random.PRNGKey(0)

    N, D = 4, 32            # N pairs -> 2N = 8 projection rows
    M = 2 * N
    projections = jax.random.normal(key, (M, D), dtype=jnp.float32)
    # Labels of length 2N: row i and row i+N are the two views of sample i.
    labels = jnp.array([0, 1, 2, 3, 0, 1, 2, 3], dtype=jnp.int32)

    ref = _reference_loss(projections, labels, temperature=0.5)

    # f32 compute path (tight check against Precision.HIGHEST reference).
    loss_f32 = contrastive_loss(projections, labels, temperature=0.5,
                                compute_dtype=jnp.float32)
    loss_f32 = jax.block_until_ready(loss_f32)
    assert jnp.allclose(loss_f32, ref, rtol=1e-4, atol=1e-4), (loss_f32, ref)

    # Default bf16 compute path (looser tolerance from the bf16 MXU cast).
    loss_bf16 = contrastive_loss(projections, labels, temperature=0.5)
    loss_bf16 = jax.block_until_ready(loss_bf16)
    assert jnp.allclose(loss_bf16, ref, rtol=2e-2, atol=2e-2), (loss_bf16, ref)

    print("KERNEL_OK")
</pallas_src>

<mosaic_0001>
module attributes {stable_mosaic.version = 11 : i64} {
  func.func @_normalize_kernel(%arg0: i32, %arg1: memref<8x128xf32, #tpu.memory_space<vmem>>, %arg2: memref<8x128xf32, #tpu.memory_space<vmem>>) attributes {dimension_semantics = [#tpu.dimension_semantics<parallel>], iteration_bounds = array<i64: 1>, scalar_prefetch = 0 : i64, scratch_operands = 0 : i64, tpu.core_type = #tpu.core_type<tc>, window_params = [{transform_indices = @transform_0, window_bounds = array<i64: 8, 128>}, {transform_indices = @transform_1, window_bounds = array<i64: 8, 128>}]} {
    %c0 = arith.constant 0 : index
    %c0_0 = arith.constant 0 : index
    %0 = vector.load %arg1[%c0, %c0_0] : memref<8x128xf32, #tpu.memory_space<vmem>>, vector<8x128xf32>
    %1 = arith.mulf %0, %0 : vector<8x128xf32>
    %cst = arith.constant dense<0.000000e+00> : vector<8xf32>
    %2 = vector.multi_reduction <add>, %1, %cst [1] : vector<8x128xf32> to vector<8xf32>
    %3 = vector.shape_cast %2 : vector<8xf32> to vector<8x1xf32>
    %cst_1 = arith.constant 1.000000e-24 : f32
    %4 = vector.broadcast %cst_1 : f32 to vector<8x1xf32>
    %5 = arith.maximumf %3, %4 : vector<8x1xf32>
    %6 = math.rsqrt %5 : vector<8x1xf32>
    %cst_2 = arith.constant 1.41421354 : f32
    %7 = vector.broadcast %cst_2 : f32 to vector<8x1xf32>
    %8 = arith.mulf %6, %7 : vector<8x1xf32>
    %9 = vector.broadcast %8 : vector<8x1xf32> to vector<8x128xf32>
    %10 = arith.mulf %0, %9 : vector<8x128xf32>
    %c0_3 = arith.constant 0 : index
    %c0_4 = arith.constant 0 : index
    %11 = vector.load %arg2[%c0_3, %c0_4] : memref<8x128xf32, #tpu.memory_space<vmem>>, vector<8x128xf32>
    tpu.vector_store %arg2[%c0_3, %c0_4], %10 {strides = array<i32>} : memref<8x128xf32, #tpu.memory_space<vmem>>, vector<8x128xf32>,
    return
  }
  func.func @transform_0(%arg0: i32) -> (i32, i32) {
    %c0_i32 = arith.constant 0 : i32
    %c0_i32_0 = arith.constant 0 : i32
    return %arg0, %c0_i32 : i32, i32
  }
  func.func @transform_1(%arg0: i32) -> (i32, i32) {
    %c0_i32 = arith.constant 0 : i32
    %c0_i32_0 = arith.constant 0 : i32
    return %arg0, %c0_i32 : i32, i32
  }
}

</mosaic_0001>

<bundles_post_ra>
// kernel: tpu_custom_call.1
= control target key start
LH: loop header
LB: loop body
LE: loop exit
PB: predicated region body
PF: predicated region fallthrough
CT: control target
= control target key end

     0   :  { %6 = vsyncpa [#allocation3], 0  ;;  %s111_s0 = inlined_call_operand.hbm [shape: f32[8,128], index: 0, kind: input, shape index: {}]   ;;  %s112_s1 = inlined_call_operand.hbm [shape: f32[8,128], index: 1, kind: output, shape index: {}]  }
   0x1   :  { %7 = vsyncpa [#allocation4], 0  ;;  %s93_s6 = smov [#allocation2]  }
   0x2   :  { %s14_s7 = sshll.u32 %s93_s6, 4  ;;  %s15_s7 = int_to_ptr.vmem [resolvable:$true] %s14_s7 }
   0x3   :  { %s57_s8 = scalar_lea.vmem %s15_s7, 128  ;;  %p62_p1 = scmp.lt.s32.totalorder %s15_s7, %s15_s7 }
   0x4   :  { %p58_p0 = scmp.ne.s32.totalorder %s15_s7, %s57_s8  ;;  %p63_p2 = scmp.lt.s32.totalorder %s57_s8, %s57_s8 }
   0x6   :  { %p64_p3 = por %p63_p2, %p62_p1 }
   0x8   :  { %p65_p4 = pnand %p64_p3, %p58_p0 }
   0xa   :  { %68 = shalt.err (!%p65_p4)
}
   0xb   :  { %17 = dma.hbm_to_vmem [thread:$0]  %s111_s0, 128, %s15_s7, [#allocation3]  }
   0xc   :  { %89 = dma.done.wait [#allocation3], 128  }
   0xd   :  { %90 = vsyncadd [#allocation3], 4294967168  ;;  %v21_v0 = vld [vmem:[#allocation2] sm:$0xff]  ;;  %s94_s11 = smov [#allocation5]  }
   0xe   :  { %v22_v1 = vmul.f32 %v21_v0, %v21_v0  ;;  %s36_s12 = sshll.u32 %s94_s11, 4  ;;  %s37_s12 = int_to_ptr.vmem [resolvable:$true] %s36_s12 }
   0xf   :  { %s69_s13 = scalar_lea.vmem %s37_s12, 128  ;;  %p74_p6 = scmp.lt.s32.totalorder %s37_s12, %s37_s12 }
  0x10   :  { %23 = vadd.xlane.f32.xlu0 %v22_v1  ;;  %p70_p5 = scmp.ne.s32.totalorder %s37_s12, %s69_s13  ;;  %p75_p7 = scmp.lt.s32.totalorder %s69_s13, %s69_s13 }
  0x12   :  { %p76_p8 = por %p75_p7, %p74_p6 }
  0x14   :  { %p77_p9 = pnand %p76_p8, %p70_p5 }
  0x99   :  { %v24_v2 = vpop.xlane.xlu0 %23 }
  0x9a   :  { %v25_v3 = vmax.f32 %v24_v2, 1e-24 }
  0x9c   :  { %47 = vrsqrt.f32 %v25_v3 }
  0xa9   :  { %v48_v4 = vpop.eup %47 }
  0xaa   :  { %v27_v5 = vmul.f32 1.4142135, %v48_v4 }
  0xac   :  { %v28_v6 = vmul.f32 %v27_v5, %v21_v0 }
  0xae   :  { %29 = vst [vmem:[#allocation5] sm:$0xff] %v28_v6 }
  0xaf   :  { %80 = shalt.err (!%p77_p9)
}
  0xb0   :  { %39 = dma.vmem_to_hbm [thread:$0]  %s37_s12, 128, %s112_s1, [#allocation4]  }
  0xb1   :  { %91 = dma.done.wait [#allocation4], 128  }
  0xb2   :  { %92 = vsyncadd [#allocation4], 4294967168 }
  0xb3   :  { %43 = vsyncpa [#allocation3], 1 }
  0xb4   :  { %44 = vsyncpa [#allocation4], 1 }

</bundles_post_ra>
